<compile_context>
chip_gen: v7x
topology: tpu7x:2x2x1
jax: 0.10.0
libtpu: 0.0.40
codegen_flags: <defaults>
</compile_context>

<pallas_src>
import jax
import jax.numpy as jnp
from jax.experimental import pallas as pl
from jax.experimental.pallas import tpu as pltpu


def reinforce_kernel(xt_ref, w1t_ref, b1_ref, w2d_ref, b2d_ref, out_ref):
    # xt_ref : [4, TB]   bf16  (features on sublanes, batch on lanes)
    # w1t_ref: [128, 4]  bf16
    # b1_ref : [128, 1]  f32
    # w2d_ref: [1, 128]  f32   (w2[:,1] - w2[:,0])
    # b2d_ref: [1, 1]    f32   (b2[1]   - b2[0])
    # out_ref: [2, TB]   f32   (row 0 = p(action 0), row 1 = p(action 1))

    # affine1: W1^T @ x  -> [128, TB], f32 accumulation on the MXU.
    h = jnp.dot(w1t_ref[...], xt_ref[...], preferred_element_type=jnp.float32)
    h = h + b1_ref[...]                      # lane-broadcast bias

    # dropout (eval mode -> identity), then ReLU in f32 on the VPU.
    h = jnp.maximum(h, 0.0)

    # affine2 collapsed to a matvec on the score difference: d = s1 - s0.
    d = jnp.dot(w2d_ref[...], h, preferred_element_type=jnp.float32)
    d = d + b2d_ref[...]                     # [1, TB]

    # 2-class softmax == sigmoid of the score difference (EUP).
    p1 = jax.nn.sigmoid(d)
    p0 = 1.0 - p1
    out_ref[...] = jnp.concatenate([p0, p1], axis=0).astype(out_ref.dtype)


def reinforce_forward(x, w1, b1, w2, b2, *, block_b=512):
    """Forward pass. x: [B, 4] f32; w1: [4,128]; b1: [1,128]; w2: [128,2]; b2: [1,2].

    Returns [B, 2] f32 softmax probabilities (eval-mode dropout).
    """
    B, F = x.shape
    H = w1.shape[1]                                     # 128
    LANE = 128

    # Lane-dense batch padding + batch block size (multiple of 128).
    b128 = max(LANE, pl.cdiv(B, LANE) * LANE)
    tb = min(block_b, b128)
    b_pad = pl.cdiv(b128, tb) * tb
    grid = (b_pad // tb,)

    # Wrapper-side layout prep: batch-on-lane transpose, bf16 MXU inputs,
    # and the layer-2 difference vector for the sigmoid trick.
    xt = jnp.zeros((F, b_pad), jnp.bfloat16).at[:, :B].set(x.T.astype(jnp.bfloat16))
    w1t = w1.T.astype(jnp.bfloat16)                                  # [128, 4]
    b1c = jnp.asarray(b1, jnp.float32).reshape(H, 1)                 # [128, 1]
    w2f = jnp.asarray(w2, jnp.float32)
    b2f = jnp.asarray(b2, jnp.float32).reshape(-1)
    w2d = (w2f[:, 1] - w2f[:, 0]).reshape(1, H)                      # [1, 128]
    b2d = (b2f[1] - b2f[0]).reshape(1, 1)                            # [1, 1]

    out_t = pl.pallas_call(
        reinforce_kernel,
        out_shape=jax.ShapeDtypeStruct((2, b_pad), jnp.float32),
        grid=grid,
        in_specs=[
            pl.BlockSpec((F, tb), lambda i: (0, i)),       # x tile (batch block)
            pl.BlockSpec((H, F), lambda i: (0, 0)),        # W1^T, VMEM-resident
            pl.BlockSpec((H, 1), lambda i: (0, 0)),        # b1,   VMEM-resident
            pl.BlockSpec((1, H), lambda i: (0, 0)),        # w2 diff
            pl.BlockSpec((1, 1), lambda i: (0, 0)),        # b2 diff
        ],
        out_specs=pl.BlockSpec((2, tb), lambda i: (0, i)), # lane-dense output
        compiler_params=pltpu.CompilerParams(
            dimension_semantics=("parallel",),             # shard batch across TCs (v7x)
        ),
    )(xt, w1t, b1c, w2d, b2d)

    # Back to the PyTorch convention [B, 2].
    return out_t[:, :B].T


def init_params(key):
    # Deterministic init mimicking nn.Linear's U(-1/sqrt(fan_in), 1/sqrt(fan_in)).
    k1, k2, k3, k4 = jax.random.split(key, 4)
    bound1 = 1.0 / jnp.sqrt(4.0)
    bound2 = 1.0 / jnp.sqrt(128.0)
    # Stored as [in, out] (transposed vs PyTorch's [out, in]).
    w1 = jax.random.uniform(k1, (4, 128), jnp.float32, -bound1, bound1)
    b1 = jax.random.uniform(k2, (1, 128), jnp.float32, -bound1, bound1)
    w2 = jax.random.uniform(k3, (128, 2), jnp.float32, -bound2, bound2)
    b2 = jax.random.uniform(k4, (1, 2), jnp.float32, -bound2, bound2)
    return w1, b1, w2, b2


if __name__ == "__main__":
    key = jax.random.PRNGKey(0)
    pk, xk = jax.random.split(key)
    w1, b1, w2, b2 = init_params(pk)

    B = 8  # small batch of cart-pole style 4-dim observations
    x = jax.random.normal(xk, (B, 4), jnp.float32)

    probs = reinforce_forward(x, w1, b1, w2, b2)
    probs = jax.block_until_ready(probs)

    # Pure-JAX reference using the same bf16-rounded MXU inputs the kernel sees
    # (f32 accumulation everywhere).
    xr = x.astype(jnp.bfloat16).astype(jnp.float32)
    w1r = w1.astype(jnp.bfloat16).astype(jnp.float32)
    h_ref = jnp.maximum(
        jnp.dot(xr, w1r, precision=jax.lax.Precision.HIGHEST) + b1, 0.0)
    s_ref = jnp.dot(h_ref, w2, precision=jax.lax.Precision.HIGHEST) + b2
    ref = jax.nn.softmax(s_ref, axis=1)

    assert probs.shape == (B, 2)
    assert jnp.allclose(probs, ref, atol=1e-3, rtol=1e-3), (
        f"max abs err = {jnp.max(jnp.abs(probs - ref))}")
    assert jnp.allclose(jnp.sum(probs, axis=1), 1.0, atol=1e-5)

    print("KERNEL_OK")
</pallas_src>

<mosaic_0001>
module attributes {stable_mosaic.version = 11 : i64} {
  func.func @reinforce_kernel(%arg0: i32, %arg1: memref<4x128xbf16, #tpu.memory_space<vmem>>, %arg2: memref<128x4xbf16, #tpu.memory_space<vmem>>, %arg3: memref<128x1xf32, #tpu.memory_space<vmem>>, %arg4: memref<1x128xf32, #tpu.memory_space<vmem>>, %arg5: memref<1x1xf32, #tpu.memory_space<vmem>>, %arg6: memref<2x128xf32, #tpu.memory_space<vmem>>) attributes {dimension_semantics = [#tpu.dimension_semantics<parallel>], iteration_bounds = array<i64: 1>, scalar_prefetch = 0 : i64, scratch_operands = 0 : i64, tpu.core_type = #tpu.core_type<tc>, window_params = [{transform_indices = @transform_0, window_bounds = array<i64: 4, 128>}, {pipeline_mode = #tpu.pipeline_mode<synchronous>, transform_indices = @transform_1, window_bounds = array<i64: 128, 4>}, {pipeline_mode = #tpu.pipeline_mode<synchronous>, transform_indices = @transform_2, window_bounds = array<i64: 128, 1>}, {pipeline_mode = #tpu.pipeline_mode<synchronous>, transform_indices = @transform_3, window_bounds = array<i64: 1, 128>}, {pipeline_mode = #tpu.pipeline_mode<synchronous>, transform_indices = @transform_4, window_bounds = array<i64: 1, 1>}, {transform_indices = @transform_5, window_bounds = array<i64: 2, 128>}]} {
    %c0 = arith.constant 0 : index
    %c0_0 = arith.constant 0 : index
    %0 = vector.load %arg2[%c0, %c0_0] : memref<128x4xbf16, #tpu.memory_space<vmem>>, vector<128x4xbf16>
    %c0_1 = arith.constant 0 : index
    %c0_2 = arith.constant 0 : index
    %1 = vector.load %arg1[%c0_1, %c0_2] : memref<4x128xbf16, #tpu.memory_space<vmem>>, vector<4x128xbf16>
    %cst = arith.constant dense<0.000000e+00> : vector<128x128xf32>
    %2 = tpu.matmul %0, %1, %cst {dimension_numbers = #tpu.dot_dimension_numbers<[1], [0], [0], [1], [0, 0, 1, 1], [], []>} : vector<128x4xbf16>, vector<4x128xbf16>, vector<128x128xf32> -> vector<128x128xf32>
    %c0_3 = arith.constant 0 : index
    %c0_4 = arith.constant 0 : index
    %3 = vector.load %arg3[%c0_3, %c0_4] : memref<128x1xf32, #tpu.memory_space<vmem>>, vector<128x1xf32>
    %4 = vector.broadcast %3 : vector<128x1xf32> to vector<128x128xf32>
    %5 = arith.addf %2, %4 : vector<128x128xf32>
    %cst_5 = arith.constant 0.000000e+00 : f32
    %6 = vector.broadcast %cst_5 : f32 to vector<128x128xf32>
    %7 = arith.maximumf %5, %6 : vector<128x128xf32>
    %c0_6 = arith.constant 0 : index
    %c0_7 = arith.constant 0 : index
    %8 = vector.load %arg4[%c0_6, %c0_7] : memref<1x128xf32, #tpu.memory_space<vmem>>, vector<1x128xf32>
    %cst_8 = arith.constant dense<0.000000e+00> : vector<1x128xf32>
    %9 = tpu.matmul %8, %7, %cst_8 {dimension_numbers = #tpu.dot_dimension_numbers<[1], [0], [0], [1], [0, 0, 1, 1], [], []>} : vector<1x128xf32>, vector<128x128xf32>, vector<1x128xf32> -> vector<1x128xf32>
    %c0_9 = arith.constant 0 : index
    %c0_10 = arith.constant 0 : index
    %10 = vector.load %arg5[%c0_9, %c0_10] : memref<1x1xf32, #tpu.memory_space<vmem>>, vector<1x1xf32>
    %11 = vector.broadcast %10 : vector<1x1xf32> to vector<1x128xf32>
    %12 = arith.addf %9, %11 : vector<1x128xf32>
    %13 = arith.negf %12 : vector<1x128xf32>
    %14 = math.exp %13 : vector<1x128xf32>
    %cst_11 = arith.constant 1.000000e+00 : f32
    %15 = vector.broadcast %cst_11 : f32 to vector<1x128xf32>
    %16 = arith.addf %15, %14 : vector<1x128xf32>
    %17 = arith.divf %15, %16 : vector<1x128xf32>
    %cst_12 = arith.constant 1.000000e+00 : f32
    %18 = vector.broadcast %cst_12 : f32 to vector<1x128xf32>
    %19 = arith.subf %18, %17 : vector<1x128xf32>
    %20 = tpu.concatenate %19, %17 in 0 : vector<1x128xf32>, vector<1x128xf32> -> vector<2x128xf32>
    %c0_13 = arith.constant 0 : index
    %c0_14 = arith.constant 0 : index
    %21 = vector.load %arg6[%c0_13, %c0_14] : memref<2x128xf32, #tpu.memory_space<vmem>>, vector<2x128xf32>
    tpu.vector_store %arg6[%c0_13, %c0_14], %20 {strides = array<i32>} : memref<2x128xf32, #tpu.memory_space<vmem>>, vector<2x128xf32>,
    return
  }
  func.func @transform_0(%arg0: i32) -> (i32, i32) {
    %c0_i32 = arith.constant 0 : i32
    %c0_i32_0 = arith.constant 0 : i32
    return %c0_i32, %arg0 : i32, i32
  }
  func.func @transform_1(%arg0: i32) -> (i32, i32) {
    %c0_i32 = arith.constant 0 : i32
    %c0_i32_0 = arith.constant 0 : i32
    %c0_i32_1 = arith.constant 0 : i32
    return %c0_i32, %c0_i32_0 : i32, i32
  }
  func.func @transform_2(%arg0: i32) -> (i32, i32) {
    %c0_i32 = arith.constant 0 : i32
    %c0_i32_0 = arith.constant 0 : i32
    %c0_i32_1 = arith.constant 0 : i32
    return %c0_i32, %c0_i32_0 : i32, i32
  }
  func.func @transform_3(%arg0: i32) -> (i32, i32) {
    %c0_i32 = arith.constant 0 : i32
    %c0_i32_0 = arith.constant 0 : i32
    %c0_i32_1 = arith.constant 0 : i32
    return %c0_i32, %c0_i32_0 : i32, i32
  }
  func.func @transform_4(%arg0: i32) -> (i32, i32) {
    %c0_i32 = arith.constant 0 : i32
    %c0_i32_0 = arith.constant 0 : i32
    %c0_i32_1 = arith.constant 0 : i32
    return %c0_i32, %c0_i32_0 : i32, i32
  }
  func.func @transform_5(%arg0: i32) -> (i32, i32) {
    %c0_i32 = arith.constant 0 : i32
    %c0_i32_0 = arith.constant 0 : i32
    return %c0_i32, %arg0 : i32, i32
  }
}

</mosaic_0001>

<bundles_post_ra>
// kernel: tpu_custom_call.1
= control target key start
LH: loop header
LB: loop body
LE: loop exit
PB: predicated region body
PF: predicated region fallthrough
CT: control target
= control target key end

     0   :  { %s735_s0 = inlined_call_operand.vmem [shape: bf16[4,128], index: 0, kind: input, shape index: {}]   ;;  %s736_s1 = inlined_call_operand.vmem [shape: bf16[128,4], index: 1, kind: input, shape index: {}]   ;;  %s737_s2 = inlined_call_operand.vmem [shape: f32[128,1], index: 2, kind: input, shape index: {}]   ;;  %s738_s3 = inlined_call_operand.vmem [shape: f32[1,128], index: 3, kind: input, shape index: {}]   ;;  %s739_s4 = inlined_call_operand.<no memory space> [shape: f32[1,1], index: 4, kind: input, shape index: {}]   ;;  %s740_s5 = inlined_call_operand.hbm [shape: f32[2,128], index: 5, kind: output, shape index: {}]  }
   0x1   :  { %v10_v0 = vstv %s739_s4 }
   0x2   :  { %11 = vst [vmem:[#allocation2] sm:$0x1] %v10_v0 }
   0x3   :  { %v40_v1 = vld [vmem:[%s735_s0] sm:$0x3]  ;;  %vm202_vm0 = vcmask 1041408   ;;  %vm177_vm1 = vcmask 31744   ;;  %v556_v4 = vld [vmem:[%s736_s1 + $0x8] sm:$0xff]   ;;  %v557_v5 = vld [vmem:[%s736_s1 + $0x10] sm:$0xff]  }
   0x4   :  { %v555_v2 = vld [vmem:[%s736_s1] sm:$0xff]   ;;  %547 = vmatprep.subr.msk.bf16.mxu0 %vm202_vm0, %v40_v1  ;;  %v204_v3 = vsel %vm202_vm0, %v40_v1, 0  ;;  %v591_v6 = vmov 0   ;;  %v558_v8 = vld [vmem:[%s736_s1 + $0x18] sm:$0xff]   ;;  %v43_v9 = vld [vmem:[%s737_s2 + $0x10] sm:$0xff] }
   0x5   :  { %471 = vmatpush3.bf16.msra.mxu0 %v204_v3  ;;  %472 = vmatprep.mubr.msk.bf16.mxu0 %vm177_vm1, %v555_v2  ;;  %v41_v7 = vld [vmem:[%s737_s2] sm:$0xff]  ;;  %v42_v11 = vld [vmem:[%s737_s2 + $0x8] sm:$0xff]  ;;  %v44_v12 = vld [vmem:[%s737_s2 + $0x18] sm:$0xff] }
   0x6   :  { %553 = vset.pattern.permute.xlu0 %v591_v6  ;;  %554 = vset.pattern.permute.xlu1 %v591_v6  ;;  %v559_v10 = vld [vmem:[%s736_s1 + $0x20] sm:$0xff]  }
   0x7   :  { %59 = vperm.xlu0 %553, %v41_v7   ;;  %69 = vperm.xlu1 %554, %v43_v9   ;;  %v45_v13 = vld [vmem:[%s737_s2 + $0x20] sm:$0xff] }
   0x8   :  { %473 = vmatmul.mubr.msk.bf16.vlgmr.msra.gmra.mrb[0].mxu0 %vm177_vm1, %v556_v4 }
   0x9   :  { %476 = vmatprep.mubr.msk.bf16.mxu0 %vm177_vm1, %v557_v5 }
   0xb   :  { %64 = vperm.xlu0 %553, %v42_v11   ;;  %74 = vperm.xlu1 %554, %v44_v12  }
  0x10   :  { %477 = vmatmul.mubr.msk.bf16.gmra.mrb[4].mxu0 %vm177_vm1, %v558_v8 }
  0x11   :  { %480 = vmatprep.mubr.msk.bf16.mxu0 %vm177_vm1, %v559_v10 }
  0x12   :  { %12 = vsyncpa [#allocation4], 0  ;;  %v46_v14 = vld [vmem:[%s737_s2 + $0x28] sm:$0xff]  ;;  %79 = vperm.xlu0 %553, %v45_v13   ;;  %v561_v16 = vld [vmem:[%s736_s1 + $0x30] sm:$0xff]   ;;  %v592_v29 = vmov 0.0|0.0   ;;  %vm593_vm2 = vmmov 0  }
  0x13   :  { %v560_v15 = vld [vmem:[%s736_s1 + $0x28] sm:$0xff]   ;;  %v47_v17 = vld [vmem:[%s737_s2 + $0x30] sm:$0xff]  ;;  %84 = vperm.xlu1 %554, %v46_v14   ;;  %v48_v18 = vld [vmem:[%s737_s2 + $0x38] sm:$0xff]  ;;  %523 = vmatprep.subr.bf16.mxu1 %v592_v29  ;;  %v594_v30 = vmov 0.0   ;;  %s595_s16 = smov [#allocation3]   ;;  %vm410_vm3 = vcmask 1040384  }
  0x14   :  { %v49_v19 = vld [vmem:[%s737_s2 + $0x40] sm:$0xff]  ;;  %v50_v20 = vld [vmem:[%s737_s2 + $0x48] sm:$0xff]  ;;  %v562_v21 = vld [vmem:[%s736_s1 + $0x38] sm:$0xff]   ;;  %520 = vmatprep.mubr.msk.f32.mxu1 %vm593_vm2, %v594_v30  ;;  %s419_s17 = sshll.u32 %s595_s16, 4  ;;  %s420_s17 = int_to_ptr.vmem [resolvable:$true] %s419_s17 }
  0x15   :  { %v51_v22 = vld [vmem:[%s737_s2 + $0x50] sm:$0xff]  ;;  %v52_v23 = vld [vmem:[%s737_s2 + $0x58] sm:$0xff]  ;;  %v53_v24 = vld [vmem:[%s737_s2 + $0x60] sm:$0xff]  ;;  %p572_p1 = scmp.lt.s32.totalorder %s420_s17, %s420_s17 }
  0x16   :  { %89 = vperm.xlu0 %553, %v47_v17   ;;  %v54_v25 = vld [vmem:[%s737_s2 + $0x68] sm:$0xff]  ;;  %v55_v26 = vld [vmem:[%s737_s2 + $0x70] sm:$0xff]  ;;  %v56_v27 = vld [vmem:[%s737_s2 + $0x78] sm:$0xff] }
  0x17   :  { %94 = vperm.xlu1 %554, %v48_v18   ;;  %v320_v28 = vld [vmem:[#allocation2] sm:$0x1] }
  0x18   :  { %481 = vmatmul.mubr.msk.bf16.gmra.mrb[8].mxu0 %vm177_vm1, %v560_v15 }
  0x19   :  { %484 = vmatprep.mubr.msk.bf16.mxu0 %vm177_vm1, %v561_v16 }
  0x1a   :  { %99 = vperm.xlu0 %553, %v49_v19  }
  0x1b   :  { %104 = vperm.xlu1 %554, %v50_v20  }
  0x1e   :  { %109 = vperm.xlu0 %553, %v51_v22  }
  0x1f   :  { %114 = vperm.xlu1 %554, %v52_v23  }
  0x20   :  { %485 = vmatmul.mubr.msk.bf16.gmra.mrb[12].mxu0 %vm177_vm1, %v562_v21 }
  0x22   :  { %119 = vperm.xlu0 %553, %v53_v24  }
  0x23   :  { %124 = vperm.xlu1 %554, %v54_v25  }
  0x26   :  { %129 = vperm.xlu0 %553, %v55_v26  }
  0x27   :  { %134 = vperm.xlu1 %554, %v56_v27  }
  0x2a   :  { %323 = vperm.xlu0 %553, %v320_v28  }
  0x86   :  { %v60_v31 = vpop.permute.xlu0 %59  ;;  %v70_v32 = vpop.permute.xlu1 %69 }
  0x8a   :  { %v65_v33 = vpop.permute.xlu0 %64  ;;  %v75_v34 = vpop.permute.xlu1 %74 }
  0x91   :  { %v80_v35 = vpop.permute.xlu0 %79 }
  0x92   :  { %v85_v36 = vpop.permute.xlu1 %84 }
  0x95   :  { %v90_v37 = vpop.permute.xlu0 %89 }
  0x96   :  { %v95_v41 = vpop.permute.xlu1 %94 }
  0x99   :  { %v100_v49 = vpop.permute.xlu0 %99 }
  0x9a   :  { %v105_v53 = vpop.permute.xlu1 %104 }
  0x9d   :  { %v110_v62 = vpop.permute.xlu0 %109 }
  0x9e   :  { %v115_v2 = vpop.permute.xlu1 %114 }
  0xa1   :  { %v120_v10 = vpop.permute.xlu0 %119 }
  0xa2   :  { %v125_v15 = vpop.permute.xlu1 %124 }
  0xa5   :  { %v130_v22 = vpop.permute.xlu0 %129 }
  0xa6   :  { %v135_v27 = vpop.permute.xlu1 %134 }
  0xdb   :  { %v474_v38 = vpop.f32.mrb[0].mxu0 }
  0xdc   :  { %v249_v39 = vadd.f32 %v474_v38, %v70_v32  ;;  %v240_v40 = vpop.f32.mrb[1].mxu0 }
  0xdd   :  { %v241_v42 = vadd.f32 %v240_v40, %v60_v31  ;;  %v475_v43 = vpop.f32.mrb[2].mxu0  ;;  %v319_v40 = vld [vmem:[%s738_s3] sm:$0x1]  ;;  %s567_s3 = scalar_lea.vmem %s420_s17, 32 }
  0xde   :  { %v252_v44 = vadd.f32 %v475_v43, %v75_v34  ;;  %v243_v45 = vpop.f32.mrb[3].mxu0  ;;  %v305_v47 = vmax.f32 %v249_v39, 0.0  ;;  %p568_p0 = scmp.ne.s32.totalorder %s420_s17, %s567_s3  ;;  %p573_p2 = scmp.lt.s32.totalorder %s567_s3, %s567_s3 }
  0xdf   :  { %v244_v46 = vadd.f32 %v243_v45, %v65_v33  ;;  %v303_v50 = vmax.f32 %v241_v42, 0.0 }
  0xe0   :  { %v306_v48 = vmax.f32 %v252_v44, 0.0  ;;  %v324_v44 = vpop.permute.xlu0 %323  ;;  %p574_p3 = por %p573_p2, %p572_p1 }
  0xe1   :  { %v304_v51 = vmax.f32 %v244_v46, 0.0 }
  0xe2   :  { %v527_v52 = vpack.c.bf16 %v306_v48, %v305_v47  ;;  %p575_p4 = pnand %p574_p3, %p568_p0 }
  0xe3   :  { %v478_v54 = vpop.f32.mrb[4].mxu0  ;;  %v524_v55 = vpack.c.bf16 %v304_v51, %v303_v50 }
  0xe4   :  { %v265_v56 = vadd.f32 %v478_v54, %v90_v37  ;;  %v256_v57 = vpop.f32.mrb[5].mxu0 }
  0xe5   :  { %v257_v58 = vadd.f32 %v256_v57, %v80_v35  ;;  %v479_v59 = vpop.f32.mrb[6].mxu0  ;;  %525 = vmatpush3.bf16.msra.mxu1 %v524_v55 }
  0xe6   :  { %v268_v60 = vadd.f32 %v479_v59, %v95_v41  ;;  %v259_v61 = vpop.f32.mrb[7].mxu0  ;;  %526 = vmatprep.subr.bf16.mxu1 %v592_v29  ;;  %v309_v0 = vmax.f32 %v265_v56, 0.0  ;;  %v326_v41 = vlaneseq }
  0xe7   :  { %v260_v63 = vadd.f32 %v259_v61, %v85_v36  ;;  %v307_v3 = vmax.f32 %v257_v58, 0.0 }
  0xe8   :  { %v310_v1 = vmax.f32 %v268_v60, 0.0  ;;  %v327_v42 = vshrl.u32 %v326_v41, 7 }
  0xe9   :  { %v308_v4 = vmax.f32 %v260_v63, 0.0  ;;  %528 = vmatpush3.bf16.msra.mxu1 %v527_v52 }
  0xea   :  { %v533_v5 = vpack.c.bf16 %v310_v1, %v309_v0  ;;  %529 = vmatprep.subr.bf16.mxu1 %v592_v29  ;;  %v328_v43 = vsub.s32 0, %v327_v42 }
  0xeb   :  { %v530_v6 = vpack.c.bf16 %v308_v4, %v307_v3  ;;  %v482_v7 = vpop.f32.mrb[8].mxu0 }
  0xec   :  { %v281_v8 = vadd.f32 %v482_v7, %v110_v62  ;;  %v272_v9 = vpop.f32.mrb[9].mxu0  ;;  %v329_v45 = vrot.slane %v324_v44, %v328_v43 }
  0xed   :  { %v273_v11 = vadd.f32 %v272_v9, %v100_v49  ;;  %v483_v12 = vpop.f32.mrb[10].mxu0  ;;  %531 = vmatpush3.bf16.msra.mxu1 %v530_v6 }
  0xee   :  { %v284_v13 = vadd.f32 %v483_v12, %v115_v2  ;;  %v275_v14 = vpop.f32.mrb[11].mxu0  ;;  %532 = vmatprep.subr.bf16.mxu1 %v592_v29  ;;  %v313_v17 = vmax.f32 %v281_v8, 0.0 }
  0xef   :  { %v276_v16 = vadd.f32 %v275_v14, %v105_v53  ;;  %v311_v19 = vmax.f32 %v273_v11, 0.0 }
  0xf0   :  { %v314_v18 = vmax.f32 %v284_v13, 0.0 }
  0xf1   :  { %v312_v20 = vmax.f32 %v276_v16, 0.0  ;;  %534 = vmatpush3.bf16.msra.mxu1 %v533_v5 }
  0xf2   :  { %v539_v21 = vpack.c.bf16 %v314_v18, %v313_v17  ;;  %535 = vmatprep.subr.bf16.mxu1 %v592_v29 }
  0xf3   :  { %v536_v23 = vpack.c.bf16 %v312_v20, %v311_v19  ;;  %v486_v24 = vpop.f32.mrb[12].mxu0 }
  0xf4   :  { %v297_v25 = vadd.f32 %v486_v24, %v130_v22  ;;  %v288_v26 = vpop.f32.mrb[13].mxu0 }
  0xf5   :  { %v289_v28 = vadd.f32 %v288_v26, %v120_v10  ;;  %v487_v30 = vpop.f32.mrb[14].mxu0  ;;  %537 = vmatpush3.bf16.msra.mxu1 %v536_v23 }
  0xf6   :  { %v300_v31 = vadd.f32 %v487_v30, %v135_v27  ;;  %v291_v32 = vpop.f32.mrb[15].mxu0  ;;  %538 = vmatprep.subr.bf16.mxu1 %v592_v29  ;;  %v317_v34 = vmax.f32 %v297_v25, 0.0 }
  0xf7   :  { %v292_v33 = vadd.f32 %v291_v32, %v125_v15  ;;  %v315_v36 = vmax.f32 %v289_v28, 0.0 }
  0xf8   :  { %v318_v35 = vmax.f32 %v300_v31, 0.0 }
  0xf9   :  { %v316_v37 = vmax.f32 %v292_v33, 0.0  ;;  %540 = vmatpush3.bf16.msra.mxu1 %v539_v21 }
  0xfa   :  { %v545_v38 = vpack.c.bf16 %v318_v35, %v317_v34  ;;  %541 = vmatprep.subr.bf16.mxu1 %v592_v29 }
  0xfb   :  { %v542_v39 = vpack.c.bf16 %v316_v37, %v315_v36 }
  0xfd   :  { %543 = vmatpush3.bf16.msra.mxu1 %v542_v39 }
  0xfe   :  { %544 = vmatprep.subr.bf16.mxu1 %v592_v29 }
 0x101   :  { %546 = vmatpush3.bf16.msra.mxu1 %v545_v38 }
 0x104   :  { %521 = vmatmul.mubr.f32.vlgmr.msra.gmra.mrb[0].mxu1 %v319_v40 }
 0x1d7   :  { %v396_v46 = vpop.f32.mrb[0].mxu1 }
 0x1d8   :  { %v397_v47 = vadd.f32 %v396_v46, %v329_v45  ;;  %v522_v48 = vpop.f32.mrb[1].mxu1 }
 0x1da   :  { %v443_v49 = vmul.f32 -1.442695, %v397_v47 }
 0x1dc   :  { %563 = vpow2.f32 %v443_v49 }
 0x1e6   :  { %v564_v50 = vpop.eup %563 }
 0x1e7   :  { %v403_v51 = vadd.f32 1.0, %v564_v50 }
 0x1e9   :  { %565 = vrcp.f32 %v403_v51 }
 0x1f3   :  { %v566_v29 = vpop.eup %565 }
 0x1f4   :  { %v406_v52 = vsub.f32 1.0, %v566_v29  ;;  %v408_v53 = vrot.slane %v566_v29, 7 }
 0x1f6   :  { %v411_v54 = vsel %vm410_vm3, %v406_v52, %v408_v53 }
 0x1f7   :  { %412 = vst [vmem:[#allocation3] sm:$0x3] %v411_v54 }
 0x1f8   :  { %578 = shalt.err (!%p575_p4)
}
 0x1f9   :  { %s579_s20 = scalar_lea.hbm %s740_s5, 32 }
 0x1fa   :  { %p580_p5 = scmp.ne.s32.totalorder %s740_s5, %s579_s20  ;;  %p583_p6 = scmp.lt.u32.totalorder %s579_s20, %s740_s5 }
 0x1fc   :  { %p585_p7 = pnand %p583_p6, %p580_p5 }
 0x1fe   :  { %588 = shalt.err (!%p585_p7)
}
 0x1ff   :  { %422 = dma.vmem_to_hbm [thread:$0]  %s420_s17, 32, %s740_s5, [#allocation4]  }
 0x200   :  { %589 = dma.done.wait [#allocation4], 32  }
 0x201   :  { %590 = vsyncadd [#allocation4], 4294967264 }
 0x202   :  { %426 = vsyncpa [#allocation4], 1 }

</bundles_post_ra>
